<compile_context>
chip_gen: v7x
topology: tpu7x:2x2x1
jax: 0.10.0
libtpu: 0.0.40
codegen_flags: <defaults>
</compile_context>

<pallas_src>
import jax
import jax.numpy as jnp
from jax.experimental import pallas as pl
from jax.experimental.pallas import tpu as pltpu


def uncertainty_kernel(x_ref, w1_ref, b1_ref, w2_ref, b2_ref, out_ref):
    x = x_ref[...]                                    # [TB, F]

    # Linear 1 + ReLU  (MXU matmul, f32 accumulation)
    h = jnp.dot(x, w1_ref[...], preferred_element_type=jnp.float32) + b1_ref[...]
    h = jnp.maximum(h, 0.0)

    # Linear 2
    logits = jnp.dot(h, w2_ref[...], preferred_element_type=jnp.float32) + b2_ref[...]

    # Evidential head.
    # TODO(synk): exp() is unguarded (as in the PyTorch module); large logits overflow.
    alpha = jnp.exp(logits) + 1.0                     # [TB, 4]
    S = jnp.sum(alpha, axis=1, keepdims=True)         # [TB, 1]
    inv_S = pl.reciprocal(S, approx=False)            # exact; EUP path, tiny (1/row)

    probs = alpha * inv_S                             # [TB, 4]
    unc = jnp.broadcast_to(2.0 * inv_S, probs.shape)  # K = 2, per original module

    # Fused lane-packed output: lanes 0..3 = probs, lanes 4..7 = 2/S (broadcast).
    out_ref[...] = jnp.concatenate([probs, unc], axis=1).astype(out_ref.dtype)


def uncertainty_estimator(x, w1, b1, w2, b2, *, tb=2048):
    """x: [B, feature_dim]. Returns (probs [B, 4], uncertainty [B])."""
    B, F = x.shape
    H = w1.shape[1]

    # Batch tile: multiple of 8 sublanes, no larger than the (rounded-up) batch.
    tb = min(tb, max(8, ((B + 7) // 8) * 8))
    tb = ((tb + 7) // 8) * 8
    Bp = ((B + tb - 1) // tb) * tb
    if Bp != B:
        x = jnp.pad(x, ((0, Bp - B), (0, 0)))

    out = pl.pallas_call(
        uncertainty_kernel,
        out_shape=jax.ShapeDtypeStruct((Bp, 8), jnp.float32),
        grid=(Bp // tb,),
        in_specs=[
            # x streams in batch tiles (double-buffered by the pipeline).
            pl.BlockSpec((tb, F), lambda i: (i, 0)),
            # Weights/biases: full arrays, constant index_map -> resident in VMEM.
            pl.BlockSpec((F, H), lambda i: (0, 0)),
            pl.BlockSpec((1, H), lambda i: (0, 0)),
            pl.BlockSpec((H, 4), lambda i: (0, 0)),
            pl.BlockSpec((1, 4), lambda i: (0, 0)),
        ],
        out_specs=pl.BlockSpec((tb, 8), lambda i: (i, 0)),
        compiler_params=pltpu.CompilerParams(
            dimension_semantics=("parallel",),        # shard batch across TCs on v7x
            vmem_limit_bytes=32 * 1024 * 1024,        # headroom over v5e's 16 MiB default
        ),
    )(x, w1, b1, w2, b2)

    probs = out[:B, :4]
    uncertainty = out[:B, 4]
    return probs, uncertainty


def init_params(key, feature_dim, hidden_dim=64):
    """Deterministic synthetic init (uniform, ~PyTorch Linear default scale)."""
    k1, k2, k3, k4 = jax.random.split(key, 4)
    lim1 = 1.0 / jnp.sqrt(feature_dim)
    lim2 = 1.0 / jnp.sqrt(hidden_dim)
    w1 = jax.random.uniform(k1, (feature_dim, hidden_dim), jnp.float32, -lim1, lim1)
    b1 = jax.random.uniform(k2, (1, hidden_dim), jnp.float32, -lim1, lim1)
    w2 = jax.random.uniform(k3, (hidden_dim, 4), jnp.float32, -lim2, lim2)
    b2 = jax.random.uniform(k4, (1, 4), jnp.float32, -lim2, lim2)
    return w1, b1, w2, b2


if __name__ == "__main__":
    B, FEATURE_DIM, HIDDEN_DIM = 16, 32, 64

    key = jax.random.PRNGKey(0)
    kx, kp = jax.random.split(key)
    x = jax.random.normal(kx, (B, FEATURE_DIM), jnp.float32)
    w1, b1, w2, b2 = init_params(kp, FEATURE_DIM, HIDDEN_DIM)

    # Small tb so the demo exercises a multi-step grid (2 batch tiles).
    probs, uncertainty = uncertainty_estimator(x, w1, b1, w2, b2, tb=8)
    jax.block_until_ready((probs, uncertainty))

    # Pure-JAX reference check
    h_ref = jnp.maximum(x @ w1 + b1, 0.0)
    alpha_ref = jnp.exp(h_ref @ w2 + b2) + 1.0
    S_ref = jnp.sum(alpha_ref, axis=1, keepdims=True)
    probs_ref = alpha_ref / S_ref
    unc_ref = 2.0 / jnp.sum(alpha_ref, axis=1)

    assert probs.shape == (B, 4) and uncertainty.shape == (B,)
    assert jnp.allclose(probs, probs_ref, atol=1e-5, rtol=1e-5)
    assert jnp.allclose(uncertainty, unc_ref, atol=1e-5, rtol=1e-5)

    print("KERNEL_OK")
</pallas_src>

<mosaic_0001>
module attributes {stable_mosaic.version = 11 : i64} {
  func.func @uncertainty_kernel(%arg0: i32, %arg1: memref<8x32xf32, #tpu.memory_space<vmem>>, %arg2: memref<32x64xf32, #tpu.memory_space<vmem>>, %arg3: memref<1x64xf32, #tpu.memory_space<vmem>>, %arg4: memref<64x4xf32, #tpu.memory_space<vmem>>, %arg5: memref<1x4xf32, #tpu.memory_space<vmem>>, %arg6: memref<8x8xf32, #tpu.memory_space<vmem>>) attributes {dimension_semantics = [#tpu.dimension_semantics<parallel>], iteration_bounds = array<i64: 2>, scalar_prefetch = 0 : i64, scratch_operands = 0 : i64, tpu.core_type = #tpu.core_type<tc>, window_params = [{transform_indices = @transform_0, window_bounds = array<i64: 8, 32>}, {pipeline_mode = #tpu.pipeline_mode<synchronous>, transform_indices = @transform_1, window_bounds = array<i64: 32, 64>}, {pipeline_mode = #tpu.pipeline_mode<synchronous>, transform_indices = @transform_2, window_bounds = array<i64: 1, 64>}, {pipeline_mode = #tpu.pipeline_mode<synchronous>, transform_indices = @transform_3, window_bounds = array<i64: 64, 4>}, {pipeline_mode = #tpu.pipeline_mode<synchronous>, transform_indices = @transform_4, window_bounds = array<i64: 1, 4>}, {transform_indices = @transform_5, window_bounds = array<i64: 8, 8>}]} {
    %c0 = arith.constant 0 : index
    %c0_0 = arith.constant 0 : index
    %0 = vector.load %arg1[%c0, %c0_0] : memref<8x32xf32, #tpu.memory_space<vmem>>, vector<8x32xf32>
    %c0_1 = arith.constant 0 : index
    %c0_2 = arith.constant 0 : index
    %1 = vector.load %arg2[%c0_1, %c0_2] : memref<32x64xf32, #tpu.memory_space<vmem>>, vector<32x64xf32>
    %cst = arith.constant dense<0.000000e+00> : vector<8x64xf32>
    %2 = tpu.matmul %0, %1, %cst {dimension_numbers = #tpu.dot_dimension_numbers<[1], [0], [0], [1], [0, 0, 1, 1], [], []>} : vector<8x32xf32>, vector<32x64xf32>, vector<8x64xf32> -> vector<8x64xf32>
    %c0_3 = arith.constant 0 : index
    %c0_4 = arith.constant 0 : index
    %3 = vector.load %arg3[%c0_3, %c0_4] : memref<1x64xf32, #tpu.memory_space<vmem>>, vector<1x64xf32>
    %4 = vector.broadcast %3 : vector<1x64xf32> to vector<8x64xf32>
    %5 = arith.addf %2, %4 : vector<8x64xf32>
    %cst_5 = arith.constant 0.000000e+00 : f32
    %6 = vector.broadcast %cst_5 : f32 to vector<8x64xf32>
    %7 = arith.maximumf %5, %6 : vector<8x64xf32>
    %c0_6 = arith.constant 0 : index
    %c0_7 = arith.constant 0 : index
    %8 = vector.load %arg4[%c0_6, %c0_7] : memref<64x4xf32, #tpu.memory_space<vmem>>, vector<64x4xf32>
    %cst_8 = arith.constant dense<0.000000e+00> : vector<8x4xf32>
    %9 = tpu.matmul %7, %8, %cst_8 {dimension_numbers = #tpu.dot_dimension_numbers<[1], [0], [0], [1], [0, 0, 1, 1], [], []>} : vector<8x64xf32>, vector<64x4xf32>, vector<8x4xf32> -> vector<8x4xf32>
    %c0_9 = arith.constant 0 : index
    %c0_10 = arith.constant 0 : index
    %10 = vector.load %arg5[%c0_9, %c0_10] : memref<1x4xf32, #tpu.memory_space<vmem>>, vector<1x4xf32>
    %11 = vector.broadcast %10 : vector<1x4xf32> to vector<8x4xf32>
    %12 = arith.addf %9, %11 : vector<8x4xf32>
    %13 = math.exp %12 : vector<8x4xf32>
    %cst_11 = arith.constant 1.000000e+00 : f32
    %14 = vector.broadcast %cst_11 : f32 to vector<8x4xf32>
    %15 = arith.addf %13, %14 : vector<8x4xf32>
    %cst_12 = arith.constant dense<0.000000e+00> : vector<8xf32>
    %16 = vector.multi_reduction <add>, %15, %cst_12 [1] : vector<8x4xf32> to vector<8xf32>
    %17 = vector.shape_cast %16 : vector<8xf32> to vector<8x1xf32>
    %18 = tpu.reciprocal %17 : vector<8x1xf32> -> vector<8x1xf32>
    %19 = vector.broadcast %18 : vector<8x1xf32> to vector<8x4xf32>
    %20 = arith.mulf %15, %19 : vector<8x4xf32>
    %cst_13 = arith.constant 2.000000e+00 : f32
    %21 = vector.broadcast %cst_13 : f32 to vector<8x1xf32>
    %22 = arith.mulf %21, %18 : vector<8x1xf32>
    %23 = vector.shape_cast %22 : vector<8x1xf32> to vector<8x1xf32>
    %24 = vector.broadcast %23 : vector<8x1xf32> to vector<8x4xf32>
    %25 = tpu.concatenate %20, %24 in 1 : vector<8x4xf32>, vector<8x4xf32> -> vector<8x8xf32>
    %c0_14 = arith.constant 0 : index
    %c0_15 = arith.constant 0 : index
    %26 = vector.load %arg6[%c0_14, %c0_15] : memref<8x8xf32, #tpu.memory_space<vmem>>, vector<8x8xf32>
    tpu.vector_store %arg6[%c0_14, %c0_15], %25 {strides = array<i32>} : memref<8x8xf32, #tpu.memory_space<vmem>>, vector<8x8xf32>,
    return
  }
  func.func @transform_0(%arg0: i32) -> (i32, i32) {
    %c0_i32 = arith.constant 0 : i32
    %c0_i32_0 = arith.constant 0 : i32
    return %arg0, %c0_i32 : i32, i32
  }
  func.func @transform_1(%arg0: i32) -> (i32, i32) {
    %c0_i32 = arith.constant 0 : i32
    %c0_i32_0 = arith.constant 0 : i32
    %c0_i32_1 = arith.constant 0 : i32
    return %c0_i32, %c0_i32_0 : i32, i32
  }
  func.func @transform_2(%arg0: i32) -> (i32, i32) {
    %c0_i32 = arith.constant 0 : i32
    %c0_i32_0 = arith.constant 0 : i32
    %c0_i32_1 = arith.constant 0 : i32
    return %c0_i32, %c0_i32_0 : i32, i32
  }
  func.func @transform_3(%arg0: i32) -> (i32, i32) {
    %c0_i32 = arith.constant 0 : i32
    %c0_i32_0 = arith.constant 0 : i32
    %c0_i32_1 = arith.constant 0 : i32
    return %c0_i32, %c0_i32_0 : i32, i32
  }
  func.func @transform_4(%arg0: i32) -> (i32, i32) {
    %c0_i32 = arith.constant 0 : i32
    %c0_i32_0 = arith.constant 0 : i32
    %c0_i32_1 = arith.constant 0 : i32
    return %c0_i32, %c0_i32_0 : i32, i32
  }
  func.func @transform_5(%arg0: i32) -> (i32, i32) {
    %c0_i32 = arith.constant 0 : i32
    %c0_i32_0 = arith.constant 0 : i32
    return %arg0, %c0_i32 : i32, i32
  }
}

</mosaic_0001>

<bundles_post_ra>
// kernel: tpu_custom_call.1
= control target key start
LH: loop header
LB: loop body
LE: loop exit
PB: predicated region body
PF: predicated region fallthrough
CT: control target
= control target key end

     0   :  { %s593_s18 = smov 0   ;;  %s659_s0 = inlined_call_operand.vmem [shape: f32[16,32], index: 0, kind: input, shape index: {}]   ;;  %s660_s1 = inlined_call_operand.vmem [shape: f32[32,64], index: 1, kind: input, shape index: {}]   ;;  %s661_s2 = inlined_call_operand.vmem [shape: f32[1,64], index: 2, kind: input, shape index: {}]   ;;  %s662_s3 = inlined_call_operand.vmem [shape: f32[64,4], index: 3, kind: input, shape index: {}]   ;;  %s663_s4 = inlined_call_operand.vmem [shape: f32[1,4], index: 4, kind: input, shape index: {}]   ;;  %s664_s5 = inlined_call_operand.vmem [shape: f32[16,8], index: 5, kind: output, shape index: {}]  }
   0x1 LB: > { %s462_s19 = sadd.s32 4294967295, %s558_s18   ;;  %p466_p0 = scmp.ge.s32.totalorder %s558_s18, 1  ;;  %s558_s18 = sphi %s593_s18, %s15_s18  }
   0x2   : > { %p186_p1 = scmp.lt.s32.totalorder %s558_s18, 3 }
   0x4   : > { %p187_p2 = pnand %p466_p0, %p186_p1 }
   0x5   : > { %v221_v0 = vld [vmem:[%s660_s1] sm:$0xff] (!%p187_p2)  ;;  %v222_v1 = vld [vmem:[%s660_s1 + $0x8] sm:$0xff] (!%p187_p2)  ;;  %v223_v2 = vld [vmem:[%s660_s1 + $0x10] sm:$0xff] (!%p187_p2)  ;;  %v560_v3 = vmov (!%p187_p2), 0.0|0.0   ;;  %vm561_vm0 = vmmov (!%p187_p2), 0   ;;  %v562_v6 = vmov (!%p187_p2), 0.0  }
   0x6   : > { %190 = sbr.rel (%p187_p2) target bundleno = 620 (0x26c), region = 40  ;;  %519 = vmatprep.subr.bf16.mxu0 (!%p187_p2), %v560_v3  ;;  %v520_v4 = vpack.c.bf16 (!%p187_p2), %v222_v1, %v221_v0  ;;  %v224_v5 = vld [vmem:[%s660_s1 + $0x18] sm:$0xff] (!%p187_p2)  ;;  %497 = vmatprep.mubr.msk.f32.mxu0 (!%p187_p2), %vm561_vm0, %v562_v6  ;;  %p212_p3 = scmp.lt.s32.totalorder (!%p187_p2), %s462_s19, 1  ;;  %v307_v7 = vld [vmem:[%s662_s3] sm:$0xff] (!%p187_p2)  ;;  %v308_v8 = vld [vmem:[%s662_s3 + $0x8] sm:$0xff] (!%p187_p2)  ;;  %vm232_vm1 = vcmask (!%p187_p2), 261120  }
   0x7   : > { %525 = vmatprep.subr.bf16.mxu1 (!%p187_p2), %v560_v3  ;;  %v526_v9 = vpack.c.bf16 (!%p187_p2), %v308_v8, %v307_v7  ;;  %v309_v10 = vld [vmem:[%s662_s3 + $0x10] sm:$0xff] (!%p187_p2)  ;;  %v310_v11 = vld [vmem:[%s662_s3 + $0x18] sm:$0xff] (!%p187_p2)  ;;  %516 = vmatprep.mubr.msk.f32.mxu1 (!%p187_p2), %vm561_vm0, %v562_v6  ;;  %v523_v12 = vpack.c.bf16 (!%p187_p2), %v224_v5, %v223_v2  ;;  %v311_v14 = vld [vmem:[%s662_s3 + $0x20] sm:$0xff] (!%p187_p2)  ;;  %vm322_vm2 = vcmask (!%p187_p2), 523264   ;;  %vm399_vm3 = vcmask (!%p187_p2), 31744  }
   0x8   : > { %521 = vmatpush3.bf16.msra.mxu0 (!%p187_p2), %v520_v4  ;;  %v529_v13 = vpack.c.bf16 (!%p187_p2), %v310_v11, %v309_v10  ;;  %v312_v15 = vld [vmem:[%s662_s3 + $0x28] sm:$0xff] (!%p187_p2)  ;;  %v313_v18 = vld [vmem:[%s662_s3 + $0x30] sm:$0xff] (!%p187_p2)  ;;  %v314_v19 = vld [vmem:[%s662_s3 + $0x38] sm:$0xff] (!%p187_p2)  ;;  %vm407_vm4 = vcmask (!%p187_p2), 64512  }
   0x9   : > { %522 = vmatprep.subr.bf16.mxu0 (!%p187_p2), %v560_v3  ;;  %527 = vmatpush3.bf16.msra.mxu1 (!%p187_p2), %v526_v9  ;;  %v532_v17 = vpack.c.bf16 (!%p187_p2), %v312_v15, %v311_v14  ;;  %v535_v20 = vpack.c.bf16 (!%p187_p2), %v314_v19, %v313_v18  ;;  %v469_v21 = vld [vmem:[%s661_s2] ss:$0 sm:$0xff] (!%p187_p2) }
   0xa   : > { %528 = vmatprep.subr.bf16.mxu1 (!%p187_p2), %v560_v3  ;;  %v471_v26 = vld [vmem:[%s663_s4] ss:$0 sm:$0xff] (!%p187_p2) }
   0xc   : > { %524 = vmatpush3.bf16.msra.mxu0 (!%p187_p2), %v523_v12 }
   0xd   : > { %s666_s19 = smov (!%p212_p3, %s462_s19), 1  ;;  %530 = vmatpush3.bf16.msra.mxu1 %v529_v13 }
   0xe   : > { %s467_s11 = sshll.u32 %s666_s19, 3  ;;  %531 = vmatprep.subr.bf16.mxu1 %v560_v3 }
   0xf   : > { %s215_s20 = scalar_lea.vmem %s659_s0, %s467_s11  ;;  %s219_s6 = scalar_lea.vmem %s664_s5, %s467_s11 }
  0x10   : > { %v220_v16 = vld [vmem:[%s215_s20] sm:$0xff] }
  0x11   : > { %498 = vmatmul.mubr.msk.f32.vlgmr.msra.gmra.mrb[0].mxu0 %vm232_vm1, %v220_v16  ;;  %533 = vmatpush3.bf16.msra.mxu1 %v532_v17 }
  0x12   : > { %534 = vmatprep.subr.bf16.mxu1 %v560_v3 }
  0x15   : > { %536 = vmatpush3.bf16.msra.mxu1 %v535_v20 }
  0xe4   : > { %v302_v22 = vpop.f32.mrb[0].mxu0 }
  0xe5   : > { %v303_v23 = vadd.f32 %v469_v21, %v302_v22  ;;  %v499_v24 = vpop.f32.mrb[1].mxu0 }
  0xe7   : > { %v306_v25 = vmax.f32 %v303_v23, 0.0 }
  0xe9   : > { %517 = vmatmul.mubr.msk.f32.vlgmr.msra.gmra.mrb[0].mxu1 %vm322_vm2, %v306_v25 }
 0x1bc   : > { %v392_v27 = vpop.f32.mrb[0].mxu1 }
 0x1bd   : > { %v393_v28 = vadd.f32 %v471_v26, %v392_v27  ;;  %v518_v29 = vpop.f32.mrb[1].mxu1 }
 0x1bf   : > { %v396_v30 = vmul.f32 1.442695, %v393_v28 }
 0x1c1   : > { %548 = vpow2.f32 %v396_v30 }
 0x1cb   : > { %v549_v31 = vpop.eup %548 }
 0x1cc   : > { %v398_v32 = vadd.f32 1.0, %v549_v31 }
 0x1ce   : > { %v400_v33 = vsel %vm399_vm3, %v398_v32, 0.0 }
 0x1cf   : > { %401 = vadd.xlane.f32.xlu0 %v400_v33 }
 0x25c   : > { %v402_v34 = vpop.xlane.xlu0 %401 }
 0x25d   : > { %550 = vrcp.f32 %v402_v34 }
 0x267   : > { %v551_v35 = vpop.eup %550 }
 0x268   : > { %v404_v36 = vmul.f32 %v551_v35, %v398_v32  ;;  %v405_v37 = vmul.f32 2.0, %v551_v35 }
 0x26a   : > { %v406_v38 = vsel %vm399_vm3, %v404_v36, %v405_v37 }
 0x26b   : > { %408 = vst.msk [vmem:[%s219_s6] sm:$0xff] %vm407_vm4, %v406_v38 }
 0x26c PF: > { %s15_s18 = sadd.s32 1, %s558_s18  }
 0x26d   : > { %p12_p4 = scmp.ge.s32.totalorder %s15_s18, 4  }
 0x26f   :  { %14 = sbr.rel (!%p12_p4) target bundleno = 1 (0x1), region = 70 }

</bundles_post_ra>
